<compile_context>
chip_gen: v7x
topology: tpu7x:2x2x1
jax: 0.10.0
libtpu: 0.0.40
codegen_flags: <defaults>
</compile_context>

<pallas_src>
import functools

import jax
import jax.numpy as jnp
import numpy as np
from jax import lax
from jax.experimental import pallas as pl
from jax.experimental.pallas import tpu as pltpu

BN_EPS = 1e-5    # nn.BatchNorm1d default eps (training mode, batch stats)
STD_EPS = 1e-4   # the 0.0001 in the std-loss


# ----------------------------------------------------------------------------
# Fused kernel: both projectors + BarlowTwins loss terms
# ----------------------------------------------------------------------------
def _fused_kernel(y1_ref, y2_ref,
                  w1a_ref, b1a_ref, w2a_ref,
                  w1i_ref, b1i_ref, w2i_ref,
                  mask_ref, out_ref,
                  *, batch_total, feat):
    # ---------------- projector: Linear -> BN (train) -> ReLU -> Linear -----
    def projector(y, w1, b1, w2):
        h = jnp.dot(y, w1, preferred_element_type=jnp.float32) + b1
        hm = jnp.mean(h, axis=0, keepdims=True)
        hv = jnp.mean((h - hm) ** 2, axis=0, keepdims=True)       # biased (BN)
        hr = jnp.maximum((h - hm) * lax.rsqrt(hv + BN_EPS), 0.0)
        return jnp.dot(hr, w2, preferred_element_type=jnp.float32)

    z1 = projector(y1_ref[...], w1a_ref[...], b1a_ref[...], w2a_ref[...])  # (B,F)
    z2 = projector(y2_ref[...], w1i_ref[...], b1i_ref[...], w2i_ref[...])  # (B,F)

    # ---------------- unique-row masked statistics ---------------------------
    mask = mask_ref[...]                          # (B, 1), 1.0 on unique rows
    cnt = jnp.maximum(jnp.sum(mask), 1.0)         # guard: never divide by 0
    inv_cnt = 1.0 / cnt

    def masked_center(z):
        zm = jnp.sum(z * mask, axis=0, keepdims=True) * inv_cnt   # (1, F)
        zc = (z - zm) * mask                      # masked rows -> exactly 0
        zss = jnp.sum(zc * zc, axis=0, keepdims=True)             # sum of squares
        return zc, zss

    zc1, zss1 = masked_center(z1)
    zc2, zss2 = masked_center(z2)

    # BatchNorm1d over the de-duped rows (biased variance).
    z1_bn = zc1 * lax.rsqrt(zss1 * inv_cnt + BN_EPS)
    z2_bn = zc2 * lax.rsqrt(zss2 * inv_cnt + BN_EPS)

    # cross-correlation c = bn(z1).T @ bn(z2): contract the batch axis.
    # (One small XLU transpose at this size; the real-size tiled version
    #  should produce z1 pre-transposed instead -- see TODO at top.)
    c = lax.dot_general(z1_bn, z2_bn, (((0,), (0,)), ((), ())),
                        preferred_element_type=jnp.float32)
    c = c * (1.0 / float(batch_total))            # c.div_(B)

    # std loss: torch.var(dim=0) is unbiased (divide by cnt-1); clamp cnt==1.
    inv_nm1 = 1.0 / jnp.maximum(cnt - 1.0, 1.0)
    std1 = jnp.sqrt(zss1 * inv_nm1 + STD_EPS)
    std2 = jnp.sqrt(zss2 * inv_nm1 + STD_EPS)
    # mean(relu(1-std1))/2 + mean(relu(1-std2))/2  == sum over both / (2F)
    std_loss = (jnp.sum(jnp.maximum(1.0 - std1, 0.0)) +
                jnp.sum(jnp.maximum(1.0 - std2, 0.0))) / (2.0 * float(feat))

    # on/off-diagonal losses (off via total - diag; one iota mask -- fine at
    # F=32, must be streamed per-tile at real sizes).
    row = lax.broadcasted_iota(jnp.int32, (feat, feat), 0)
    col = lax.broadcasted_iota(jnp.int32, (feat, feat), 1)
    diag_mask = row == col
    c2 = c * c
    diag_sq = jnp.sum(jnp.where(diag_mask, c2, 0.0))
    on_diag = jnp.sum(jnp.where(diag_mask, (c - 1.0) ** 2, 0.0))
    off_diag = jnp.sum(c2) - diag_sq

    out_ref[0] = on_diag
    out_ref[1] = off_diag
    out_ref[2] = std_loss


# ----------------------------------------------------------------------------
# Jitted wrapper: on-device mask + one pallas_call, single dispatch per step
# ----------------------------------------------------------------------------
@jax.jit
def _forward_jit(y1, y2, ids, w1a, b1a, w2a, w1i, b1i, w2i):
    B, D = y1.shape
    H = w1a.shape[1]
    F = w2a.shape[1]

    # First-occurrence mask, fully vectorized on device (no host sync):
    # row i is unique iff no j < i has ids[j] == ids[i].
    eq = ids[:, None] == ids[None, :]                               # (B, B)
    earlier = jnp.arange(B)[None, :] < jnp.arange(B)[:, None]       # j < i
    dup = jnp.any(eq & earlier, axis=1)                             # (B,)
    mask = jnp.where(dup, 0.0, 1.0).astype(jnp.float32)[:, None]    # (B, 1)

    kernel = functools.partial(_fused_kernel, batch_total=B, feat=F)

    flops = 2 * (2 * B * D * H) + 2 * (2 * B * H * F) + 2 * B * F * F
    transcendentals = 2 * H + 4 * F
    bytes_accessed = 4 * (2 * B * D + 2 * (D * H + H + H * F) + B + 3)

    vmem_spec = pl.BlockSpec(memory_space=pltpu.MemorySpace.VMEM)
    out = pl.pallas_call(
        kernel,
        out_shape=jax.ShapeDtypeStruct((3,), jnp.float32),
        in_specs=[vmem_spec] * 9,
        out_specs=pl.BlockSpec(memory_space=pltpu.MemorySpace.SMEM),
        cost_estimate=pl.CostEstimate(flops=flops,
                                      transcendentals=transcendentals,
                                      bytes_accessed=bytes_accessed),
    )(y1, y2, w1a, b1a, w2a, w1i, b1i, w2i, mask)

    return {'on_diag': out[0], 'off_diag': out[1], 'coarse_std_loss': out[2]}


def barlow_twins_forward(y1, y2, ids, params_a, params_i, same_projector=False):
    if same_projector:
        # TODO(synk): at real sizes, stack the two views along the batch axis
        # and share one weight set instead of passing the same weights twice.
        params_i = params_a
    w1a, b1a, w2a = params_a
    w1i, b1i, w2i = params_i
    return _forward_jit(y1, y2, ids, w1a, b1a, w2a, w1i, b1i, w2i)


# ----------------------------------------------------------------------------
# Pure-JAX reference (original gather-based semantics, for verification)
# ----------------------------------------------------------------------------
def _ref_projector(y, w1, b1, w2):
    h = y @ w1 + b1
    m = h.mean(0, keepdims=True)
    v = ((h - m) ** 2).mean(0, keepdims=True)
    hn = (h - m) / jnp.sqrt(v + BN_EPS)
    return jnp.maximum(hn, 0.0) @ w2


def _ref_forward(y1, y2, ids, params_a, params_i):
    B = y1.shape[0]
    z1 = _ref_projector(y1, *params_a)
    z2 = _ref_projector(y2, *params_i)
    seen, uidx = set(), []
    for i, img_id in enumerate(ids):
        if img_id not in seen:
            seen.add(img_id)
            uidx.append(i)
    z1 = z1[jnp.asarray(uidx)]
    z2 = z2[jnp.asarray(uidx)]
    M = len(uidx)

    def bn(z):
        m = z.mean(0, keepdims=True)
        v = ((z - m) ** 2).mean(0, keepdims=True)
        return (z - m) / jnp.sqrt(v + BN_EPS)

    c = bn(z1).T @ bn(z2)
    z1c = z1 - z1.mean(0, keepdims=True)
    z2c = z2 - z2.mean(0, keepdims=True)
    std1 = jnp.sqrt((z1c ** 2).sum(0) / (M - 1) + STD_EPS)
    std2 = jnp.sqrt((z2c ** 2).sum(0) / (M - 1) + STD_EPS)
    std_loss = (jnp.maximum(1 - std1, 0).mean() / 2 +
                jnp.maximum(1 - std2, 0).mean() / 2)
    c = c / B
    on_diag = jnp.sum((jnp.diagonal(c) - 1.0) ** 2)
    off_diag = jnp.sum(c ** 2) - jnp.sum(jnp.diagonal(c) ** 2)
    return {'on_diag': on_diag, 'off_diag': off_diag,
            'coarse_std_loss': std_loss}


if __name__ == "__main__":
    # Small shapes: batch B=8, input dim 32, projector_mlp = "32-64-32"
    B, D_IN, H, F = 8, 32, 64, 32

    key = jax.random.PRNGKey(0)
    k = jax.random.split(key, 8)
    y1 = jax.random.normal(k[0], (B, D_IN), dtype=jnp.float32)
    y2 = jax.random.normal(k[1], (B, D_IN), dtype=jnp.float32)
    ids_list = [0, 1, 2, 0, 3, 1, 4, 5]          # -> 6 unique rows
    ids = jnp.asarray(ids_list, dtype=jnp.int32)

    def init_projector(k0, k1, k2):
        w1 = jax.random.normal(k0, (D_IN, H), dtype=jnp.float32) / np.sqrt(D_IN)
        b1 = jax.random.normal(k1, (1, H), dtype=jnp.float32) * 0.01
        w2 = jax.random.normal(k2, (H, F), dtype=jnp.float32) / np.sqrt(H)
        return (w1, b1, w2)

    params_a = init_projector(k[2], k[3], k[4])
    params_i = init_projector(k[5], k[6], k[7])   # args.same_projector = False

    out = barlow_twins_forward(y1, y2, ids, params_a, params_i,
                               same_projector=False)
    out = jax.tree_util.tree_map(jax.block_until_ready, out)

    ref = _ref_forward(y1, y2, ids_list, params_a, params_i)
    for name in ('on_diag', 'off_diag', 'coarse_std_loss'):
        np.testing.assert_allclose(np.asarray(out[name]),
                                   np.asarray(ref[name]),
                                   rtol=1e-4, atol=1e-4)

    print("KERNEL_OK")
</pallas_src>

<mosaic_0001>
module attributes {stable_mosaic.version = 11 : i64} {
  func.func @_fused_kernel(%arg0: memref<8x32xf32, #tpu.memory_space<vmem>>, %arg1: memref<8x32xf32, #tpu.memory_space<vmem>>, %arg2: memref<32x64xf32, #tpu.memory_space<vmem>>, %arg3: memref<1x64xf32, #tpu.memory_space<vmem>>, %arg4: memref<64x32xf32, #tpu.memory_space<vmem>>, %arg5: memref<32x64xf32, #tpu.memory_space<vmem>>, %arg6: memref<1x64xf32, #tpu.memory_space<vmem>>, %arg7: memref<64x32xf32, #tpu.memory_space<vmem>>, %arg8: memref<8x1xf32, #tpu.memory_space<vmem>>, %arg9: memref<3xf32, #tpu.memory_space<smem>>) attributes {dimension_semantics = [], scalar_prefetch = 0 : i64, scratch_operands = 0 : i64, tpu.core_type = #tpu.core_type<tc>} {
    %c0 = arith.constant 0 : index
    %c0_0 = arith.constant 0 : index
    %0 = vector.load %arg0[%c0, %c0_0] : memref<8x32xf32, #tpu.memory_space<vmem>>, vector<8x32xf32>
    %c0_1 = arith.constant 0 : index
    %c0_2 = arith.constant 0 : index
    %1 = vector.load %arg2[%c0_1, %c0_2] : memref<32x64xf32, #tpu.memory_space<vmem>>, vector<32x64xf32>
    %c0_3 = arith.constant 0 : index
    %c0_4 = arith.constant 0 : index
    %2 = vector.load %arg3[%c0_3, %c0_4] : memref<1x64xf32, #tpu.memory_space<vmem>>, vector<1x64xf32>
    %c0_5 = arith.constant 0 : index
    %c0_6 = arith.constant 0 : index
    %3 = vector.load %arg4[%c0_5, %c0_6] : memref<64x32xf32, #tpu.memory_space<vmem>>, vector<64x32xf32>
    %cst = arith.constant dense<0.000000e+00> : vector<8x64xf32>
    %4 = tpu.matmul %0, %1, %cst {dimension_numbers = #tpu.dot_dimension_numbers<[1], [0], [0], [1], [0, 0, 1, 1], [], []>} : vector<8x32xf32>, vector<32x64xf32>, vector<8x64xf32> -> vector<8x64xf32>
    %5 = vector.broadcast %2 : vector<1x64xf32> to vector<8x64xf32>
    %6 = arith.addf %4, %5 : vector<8x64xf32>
    %cst_7 = arith.constant dense<0.000000e+00> : vector<64xf32>
    %7 = vector.multi_reduction <add>, %6, %cst_7 [0] : vector<8x64xf32> to vector<64xf32>
    %8 = vector.shape_cast %7 : vector<64xf32> to vector<1x64xf32>
    %cst_8 = arith.constant 8.000000e+00 : f32
    %9 = vector.broadcast %cst_8 : f32 to vector<1x64xf32>
    %10 = arith.divf %8, %9 : vector<1x64xf32>
    %11 = vector.broadcast %10 : vector<1x64xf32> to vector<8x64xf32>
    %12 = arith.subf %6, %11 : vector<8x64xf32>
    %13 = arith.mulf %12, %12 : vector<8x64xf32>
    %cst_9 = arith.constant dense<0.000000e+00> : vector<64xf32>
    %14 = vector.multi_reduction <add>, %13, %cst_9 [0] : vector<8x64xf32> to vector<64xf32>
    %15 = vector.shape_cast %14 : vector<64xf32> to vector<1x64xf32>
    %cst_10 = arith.constant 8.000000e+00 : f32
    %16 = vector.broadcast %cst_10 : f32 to vector<1x64xf32>
    %17 = arith.divf %15, %16 : vector<1x64xf32>
    %18 = vector.broadcast %10 : vector<1x64xf32> to vector<8x64xf32>
    %19 = arith.subf %6, %18 : vector<8x64xf32>
    %cst_11 = arith.constant 9.99999974E-6 : f32
    %20 = vector.broadcast %cst_11 : f32 to vector<1x64xf32>
    %21 = arith.addf %17, %20 : vector<1x64xf32>
    %22 = math.rsqrt %21 : vector<1x64xf32>
    %23 = vector.broadcast %22 : vector<1x64xf32> to vector<8x64xf32>
    %24 = arith.mulf %19, %23 : vector<8x64xf32>
    %cst_12 = arith.constant 0.000000e+00 : f32
    %25 = vector.broadcast %cst_12 : f32 to vector<8x64xf32>
    %26 = arith.maximumf %24, %25 : vector<8x64xf32>
    %cst_13 = arith.constant dense<0.000000e+00> : vector<8x32xf32>
    %27 = tpu.matmul %26, %3, %cst_13 {dimension_numbers = #tpu.dot_dimension_numbers<[1], [0], [0], [1], [0, 0, 1, 1], [], []>} : vector<8x64xf32>, vector<64x32xf32>, vector<8x32xf32> -> vector<8x32xf32>
    %c0_14 = arith.constant 0 : index
    %c0_15 = arith.constant 0 : index
    %28 = vector.load %arg1[%c0_14, %c0_15] : memref<8x32xf32, #tpu.memory_space<vmem>>, vector<8x32xf32>
    %c0_16 = arith.constant 0 : index
    %c0_17 = arith.constant 0 : index
    %29 = vector.load %arg5[%c0_16, %c0_17] : memref<32x64xf32, #tpu.memory_space<vmem>>, vector<32x64xf32>
    %c0_18 = arith.constant 0 : index
    %c0_19 = arith.constant 0 : index
    %30 = vector.load %arg6[%c0_18, %c0_19] : memref<1x64xf32, #tpu.memory_space<vmem>>, vector<1x64xf32>
    %c0_20 = arith.constant 0 : index
    %c0_21 = arith.constant 0 : index
    %31 = vector.load %arg7[%c0_20, %c0_21] : memref<64x32xf32, #tpu.memory_space<vmem>>, vector<64x32xf32>
    %cst_22 = arith.constant dense<0.000000e+00> : vector<8x64xf32>
    %32 = tpu.matmul %28, %29, %cst_22 {dimension_numbers = #tpu.dot_dimension_numbers<[1], [0], [0], [1], [0, 0, 1, 1], [], []>} : vector<8x32xf32>, vector<32x64xf32>, vector<8x64xf32> -> vector<8x64xf32>
    %33 = vector.broadcast %30 : vector<1x64xf32> to vector<8x64xf32>
    %34 = arith.addf %32, %33 : vector<8x64xf32>
    %cst_23 = arith.constant dense<0.000000e+00> : vector<64xf32>
    %35 = vector.multi_reduction <add>, %34, %cst_23 [0] : vector<8x64xf32> to vector<64xf32>
    %36 = vector.shape_cast %35 : vector<64xf32> to vector<1x64xf32>
    %cst_24 = arith.constant 8.000000e+00 : f32
    %37 = vector.broadcast %cst_24 : f32 to vector<1x64xf32>
    %38 = arith.divf %36, %37 : vector<1x64xf32>
    %39 = vector.broadcast %38 : vector<1x64xf32> to vector<8x64xf32>
    %40 = arith.subf %34, %39 : vector<8x64xf32>
    %41 = arith.mulf %40, %40 : vector<8x64xf32>
    %cst_25 = arith.constant dense<0.000000e+00> : vector<64xf32>
    %42 = vector.multi_reduction <add>, %41, %cst_25 [0] : vector<8x64xf32> to vector<64xf32>
    %43 = vector.shape_cast %42 : vector<64xf32> to vector<1x64xf32>
    %cst_26 = arith.constant 8.000000e+00 : f32
    %44 = vector.broadcast %cst_26 : f32 to vector<1x64xf32>
    %45 = arith.divf %43, %44 : vector<1x64xf32>
    %46 = vector.broadcast %38 : vector<1x64xf32> to vector<8x64xf32>
    %47 = arith.subf %34, %46 : vector<8x64xf32>
    %cst_27 = arith.constant 9.99999974E-6 : f32
    %48 = vector.broadcast %cst_27 : f32 to vector<1x64xf32>
    %49 = arith.addf %45, %48 : vector<1x64xf32>
    %50 = math.rsqrt %49 : vector<1x64xf32>
    %51 = vector.broadcast %50 : vector<1x64xf32> to vector<8x64xf32>
    %52 = arith.mulf %47, %51 : vector<8x64xf32>
    %cst_28 = arith.constant 0.000000e+00 : f32
    %53 = vector.broadcast %cst_28 : f32 to vector<8x64xf32>
    %54 = arith.maximumf %52, %53 : vector<8x64xf32>
    %cst_29 = arith.constant dense<0.000000e+00> : vector<8x32xf32>
    %55 = tpu.matmul %54, %31, %cst_29 {dimension_numbers = #tpu.dot_dimension_numbers<[1], [0], [0], [1], [0, 0, 1, 1], [], []>} : vector<8x64xf32>, vector<64x32xf32>, vector<8x32xf32> -> vector<8x32xf32>
    %c0_30 = arith.constant 0 : index
    %c0_31 = arith.constant 0 : index
    %56 = vector.load %arg8[%c0_30, %c0_31] : memref<8x1xf32, #tpu.memory_space<vmem>>, vector<8x1xf32>
    %57 = vector.shape_cast %56 : vector<8x1xf32> to vector<1x8x1xf32>
    %cst_32 = arith.constant dense<0.000000e+00> : vector<1xf32>
    %58 = vector.multi_reduction <add>, %57, %cst_32 [1, 2] : vector<1x8x1xf32> to vector<1xf32>
    %59 = vector.shape_cast %58 : vector<1xf32> to vector<1x1x1xf32>
    %60 = vector.extract %59[0, 0, 0] : f32 from vector<1x1x1xf32>
    %cst_33 = arith.constant 1.000000e+00 : f32
    %61 = arith.maximumf %60, %cst_33 : f32
    %cst_34 = arith.constant 1.000000e+00 : f32
    %62 = arith.divf %cst_34, %61 : f32
    %63 = vector.broadcast %56 : vector<8x1xf32> to vector<8x32xf32>
    %64 = arith.mulf %27, %63 : vector<8x32xf32>
    %cst_35 = arith.constant dense<0.000000e+00> : vector<32xf32>
    %65 = vector.multi_reduction <add>, %64, %cst_35 [0] : vector<8x32xf32> to vector<32xf32>
    %66 = vector.shape_cast %65 : vector<32xf32> to vector<1x32xf32>
    %67 = vector.broadcast %62 : f32 to vector<1x32xf32>
    %68 = arith.mulf %66, %67 : vector<1x32xf32>
    %69 = vector.broadcast %68 : vector<1x32xf32> to vector<8x32xf32>
    %70 = arith.subf %27, %69 : vector<8x32xf32>
    %71 = vector.broadcast %56 : vector<8x1xf32> to vector<8x32xf32>
    %72 = arith.mulf %70, %71 : vector<8x32xf32>
    %73 = arith.mulf %72, %72 : vector<8x32xf32>
    %cst_36 = arith.constant dense<0.000000e+00> : vector<32xf32>
    %74 = vector.multi_reduction <add>, %73, %cst_36 [0] : vector<8x32xf32> to vector<32xf32>
    %75 = vector.shape_cast %74 : vector<32xf32> to vector<1x32xf32>
    %76 = vector.broadcast %56 : vector<8x1xf32> to vector<8x32xf32>
    %77 = arith.mulf %55, %76 : vector<8x32xf32>
    %cst_37 = arith.constant dense<0.000000e+00> : vector<32xf32>
    %78 = vector.multi_reduction <add>, %77, %cst_37 [0] : vector<8x32xf32> to vector<32xf32>
    %79 = vector.shape_cast %78 : vector<32xf32> to vector<1x32xf32>
    %80 = vector.broadcast %62 : f32 to vector<1x32xf32>
    %81 = arith.mulf %79, %80 : vector<1x32xf32>
    %82 = vector.broadcast %81 : vector<1x32xf32> to vector<8x32xf32>
    %83 = arith.subf %55, %82 : vector<8x32xf32>
    %84 = vector.broadcast %56 : vector<8x1xf32> to vector<8x32xf32>
    %85 = arith.mulf %83, %84 : vector<8x32xf32>
    %86 = arith.mulf %85, %85 : vector<8x32xf32>
    %cst_38 = arith.constant dense<0.000000e+00> : vector<32xf32>
    %87 = vector.multi_reduction <add>, %86, %cst_38 [0] : vector<8x32xf32> to vector<32xf32>
    %88 = vector.shape_cast %87 : vector<32xf32> to vector<1x32xf32>
    %89 = vector.broadcast %62 : f32 to vector<1x32xf32>
    %90 = arith.mulf %75, %89 : vector<1x32xf32>
    %cst_39 = arith.constant 9.99999974E-6 : f32
    %91 = vector.broadcast %cst_39 : f32 to vector<1x32xf32>
    %92 = arith.addf %90, %91 : vector<1x32xf32>
    %93 = math.rsqrt %92 : vector<1x32xf32>
    %94 = vector.broadcast %93 : vector<1x32xf32> to vector<8x32xf32>
    %95 = arith.mulf %72, %94 : vector<8x32xf32>
    %96 = vector.broadcast %62 : f32 to vector<1x32xf32>
    %97 = arith.mulf %88, %96 : vector<1x32xf32>
    %cst_40 = arith.constant 9.99999974E-6 : f32
    %98 = vector.broadcast %cst_40 : f32 to vector<1x32xf32>
    %99 = arith.addf %97, %98 : vector<1x32xf32>
    %100 = math.rsqrt %99 : vector<1x32xf32>
    %101 = vector.broadcast %100 : vector<1x32xf32> to vector<8x32xf32>
    %102 = arith.mulf %85, %101 : vector<8x32xf32>
    %cst_41 = arith.constant dense<0.000000e+00> : vector<32x32xf32>
    %103 = tpu.matmul %95, %102, %cst_41 {dimension_numbers = #tpu.dot_dimension_numbers<[0], [0], [1], [1], [0, 1, 1, 1], [], []>} : vector<8x32xf32>, vector<8x32xf32>, vector<32x32xf32> -> vector<32x32xf32>
    %cst_42 = arith.constant 1.250000e-01 : f32
    %104 = vector.broadcast %cst_42 : f32 to vector<32x32xf32>
    %105 = arith.mulf %103, %104 : vector<32x32xf32>
    %cst_43 = arith.constant 1.000000e+00 : f32
    %106 = arith.subf %61, %cst_43 : f32
    %cst_44 = arith.constant 1.000000e+00 : f32
    %107 = arith.maximumf %106, %cst_44 : f32
    %cst_45 = arith.constant 1.000000e+00 : f32
    %108 = arith.divf %cst_45, %107 : f32
    %109 = vector.broadcast %108 : f32 to vector<1x32xf32>
    %110 = arith.mulf %75, %109 : vector<1x32xf32>
    %cst_46 = arith.constant 9.99999974E-5 : f32
    %111 = vector.broadcast %cst_46 : f32 to vector<1x32xf32>
    %112 = arith.addf %110, %111 : vector<1x32xf32>
    %113 = math.sqrt %112 : vector<1x32xf32>
    %114 = vector.broadcast %108 : f32 to vector<1x32xf32>
    %115 = arith.mulf %88, %114 : vector<1x32xf32>
    %cst_47 = arith.constant 9.99999974E-5 : f32
    %116 = vector.broadcast %cst_47 : f32 to vector<1x32xf32>
    %117 = arith.addf %115, %116 : vector<1x32xf32>
    %118 = math.sqrt %117 : vector<1x32xf32>
    %cst_48 = arith.constant 1.000000e+00 : f32
    %119 = vector.broadcast %cst_48 : f32 to vector<1x32xf32>
    %120 = arith.subf %119, %113 : vector<1x32xf32>
    %cst_49 = arith.constant 0.000000e+00 : f32
    %121 = vector.broadcast %cst_49 : f32 to vector<1x32xf32>
    %122 = arith.maximumf %120, %121 : vector<1x32xf32>
    %123 = vector.shape_cast %122 : vector<1x32xf32> to vector<1x1x32xf32>
    %cst_50 = arith.constant dense<0.000000e+00> : vector<1xf32>
    %124 = vector.multi_reduction <add>, %123, %cst_50 [1, 2] : vector<1x1x32xf32> to vector<1xf32>
    %125 = vector.shape_cast %124 : vector<1xf32> to vector<1x1x1xf32>
    %126 = vector.extract %125[0, 0, 0] : f32 from vector<1x1x1xf32>
    %cst_51 = arith.constant 1.000000e+00 : f32
    %127 = vector.broadcast %cst_51 : f32 to vector<1x32xf32>
    %128 = arith.subf %127, %118 : vector<1x32xf32>
    %cst_52 = arith.constant 0.000000e+00 : f32
    %129 = vector.broadcast %cst_52 : f32 to vector<1x32xf32>
    %130 = arith.maximumf %128, %129 : vector<1x32xf32>
    %131 = vector.shape_cast %130 : vector<1x32xf32> to vector<1x1x32xf32>
    %cst_53 = arith.constant dense<0.000000e+00> : vector<1xf32>
    %132 = vector.multi_reduction <add>, %131, %cst_53 [1, 2] : vector<1x1x32xf32> to vector<1xf32>
    %133 = vector.shape_cast %132 : vector<1xf32> to vector<1x1x1xf32>
    %134 = vector.extract %133[0, 0, 0] : f32 from vector<1x1x1xf32>
    %135 = arith.addf %126, %134 : f32
    %cst_54 = arith.constant 6.400000e+01 : f32
    %136 = arith.divf %135, %cst_54 : f32
    %137 = tpu.iota {dimensions = array<i32: 0>} : vector<32x32xi32>
    %138 = tpu.iota {dimensions = array<i32: 1>} : vector<32x32xi32>
    %139 = arith.cmpi eq, %137, %138 : vector<32x32xi32>
    %140 = arith.mulf %105, %105 : vector<32x32xf32>
    %cst_55 = arith.constant 0.000000e+00 : f32
    %141 = vector.broadcast %cst_55 : f32 to vector<32x32xf32>
    %142 = arith.select %139, %140, %141 : vector<32x32xi1>, vector<32x32xf32>
    %143 = vector.shape_cast %142 : vector<32x32xf32> to vector<1x32x32xf32>
    %cst_56 = arith.constant dense<0.000000e+00> : vector<1xf32>
    %144 = vector.multi_reduction <add>, %143, %cst_56 [1, 2] : vector<1x32x32xf32> to vector<1xf32>
    %145 = vector.shape_cast %144 : vector<1xf32> to vector<1x1x1xf32>
    %146 = vector.extract %145[0, 0, 0] : f32 from vector<1x1x1xf32>
    %cst_57 = arith.constant 1.000000e+00 : f32
    %147 = vector.broadcast %cst_57 : f32 to vector<32x32xf32>
    %148 = arith.subf %105, %147 : vector<32x32xf32>
    %149 = arith.mulf %148, %148 : vector<32x32xf32>
    %cst_58 = arith.constant 0.000000e+00 : f32
    %150 = vector.broadcast %cst_58 : f32 to vector<32x32xf32>
    %151 = arith.select %139, %149, %150 : vector<32x32xi1>, vector<32x32xf32>
    %152 = vector.shape_cast %151 : vector<32x32xf32> to vector<1x32x32xf32>
    %cst_59 = arith.constant dense<0.000000e+00> : vector<1xf32>
    %153 = vector.multi_reduction <add>, %152, %cst_59 [1, 2] : vector<1x32x32xf32> to vector<1xf32>
    %154 = vector.shape_cast %153 : vector<1xf32> to vector<1x1x1xf32>
    %155 = vector.extract %154[0, 0, 0] : f32 from vector<1x1x1xf32>
    %156 = vector.shape_cast %140 : vector<32x32xf32> to vector<1x32x32xf32>
    %cst_60 = arith.constant dense<0.000000e+00> : vector<1xf32>
    %157 = vector.multi_reduction <add>, %156, %cst_60 [1, 2] : vector<1x32x32xf32> to vector<1xf32>
    %158 = vector.shape_cast %157 : vector<1xf32> to vector<1x1x1xf32>
    %159 = vector.extract %158[0, 0, 0] : f32 from vector<1x1x1xf32>
    %160 = arith.subf %159, %146 : f32
    %c0_61 = arith.constant 0 : index
    %161 = memref.load %arg9[%c0_61] : memref<3xf32, #tpu.memory_space<smem>>
    memref.store %155, %arg9[%c0_61] : memref<3xf32, #tpu.memory_space<smem>>
    %c1 = arith.constant 1 : index
    %162 = memref.load %arg9[%c1] : memref<3xf32, #tpu.memory_space<smem>>
    memref.store %160, %arg9[%c1] : memref<3xf32, #tpu.memory_space<smem>>
    %c2 = arith.constant 2 : index
    %163 = memref.load %arg9[%c2] : memref<3xf32, #tpu.memory_space<smem>>
    memref.store %136, %arg9[%c2] : memref<3xf32, #tpu.memory_space<smem>>
    return
  }
}

</mosaic_0001>

<bundles_post_ra>
// kernel: _forward_jit.1
= control target key start
LH: loop header
LB: loop body
LE: loop exit
PB: predicated region body
PF: predicated region fallthrough
CT: control target
= control target key end

     0   :  { %v973_v3 = vmov 0.0|0.0   ;;  %vm974_vm0 = vmmov 0   ;;  %v975_v6 = vmov 0.0   ;;  %s1161_s0 = inlined_call_operand.vmem [shape: f32[8,32], index: 0, kind: input, shape index: {}]   ;;  %s1162_s1 = inlined_call_operand.vmem [shape: f32[8,32], index: 1, kind: input, shape index: {}]   ;;  %s1163_s2 = inlined_call_operand.vmem [shape: f32[32,64], index: 2, kind: input, shape index: {}]   ;;  %s1164_s3 = inlined_call_operand.vmem [shape: f32[1,64], index: 3, kind: input, shape index: {}]   ;;  %s1165_s4 = inlined_call_operand.vmem [shape: f32[64,32], index: 4, kind: input, shape index: {}]   ;;  %s1166_s5 = inlined_call_operand.vmem [shape: f32[32,64], index: 5, kind: input, shape index: {}]   ;;  %s1167_s6 = inlined_call_operand.vmem [shape: f32[1,64], index: 6, kind: input, shape index: {}]   ;;  %s1168_s7 = inlined_call_operand.vmem [shape: f32[64,32], index: 7, kind: input, shape index: {}]   ;;  %s1169_s8 = inlined_call_operand.vmem [shape: f32[8,1], index: 8, kind: input, shape index: {}]   ;;  %s1170_s9 = inlined_call_operand.vmem [shape: f32[3], index: 9, kind: output, shape index: {}]  }
   0x1   :  { %v34_v0 = vld [vmem:[%s1163_s2] sm:$0xff]  ;;  %v35_v1 = vld [vmem:[%s1163_s2 + $0x8] sm:$0xff]  ;;  %v36_v2 = vld [vmem:[%s1163_s2 + $0x10] sm:$0xff]  ;;  %884 = vmatprep.subr.bf16.mxu0 %v973_v3  ;;  %824 = vmatprep.mubr.msk.f32.mxu0 %vm974_vm0, %v975_v6 }
   0x2   :  { %v885_v4 = vpack.c.bf16 %v35_v1, %v34_v0  ;;  %v37_v5 = vld [vmem:[%s1163_s2 + $0x18] sm:$0xff]  ;;  %890 = vmatprep.subr.bf16.mxu1 %v973_v3  ;;  %843 = vmatprep.mubr.msk.f32.mxu1 %vm974_vm0, %v975_v6 }
   0x3   :  { %v888_v7 = vpack.c.bf16 %v37_v5, %v36_v2 }
   0x4   :  { %886 = vmatpush3.bf16.msra.mxu0 %v885_v4 }
   0x5   :  { %14 = vsyncpa [#allocation3], 0  ;;  %887 = vmatprep.subr.bf16.mxu0 %v973_v3  ;;  %v225_v8 = vld [vmem:[%s1166_s5] sm:$0xff]  ;;  %v226_v9 = vld [vmem:[%s1166_s5 + $0x8] sm:$0xff]  ;;  %vm53_vm1 = vcmask 261120   ;;  %vm413_vm2 = vcmask 7168  }
   0x6   :  { %v33_v10 = vld [vmem:[%s1161_s0] sm:$0xff]  ;;  %v903_v11 = vpack.c.bf16 %v226_v9, %v225_v8  ;;  %v227_v12 = vld [vmem:[%s1166_s5 + $0x10] sm:$0xff]  ;;  %v228_v13 = vld [vmem:[%s1166_s5 + $0x18] sm:$0xff]  ;;  %v976_v42 = vmov 0   ;;  %vm127_vm3 = vcmask 523264   ;;  %vm640_vm6 = vcmask 253952  }
   0x7   :  { %v906_v14 = vpack.c.bf16 %v228_v13, %v227_v12  ;;  %v224_v15 = vld [vmem:[%s1162_s1] sm:$0xff]  ;;  %v40_v19 = vld [vmem:[%s1165_s4 + $0x8] sm:$0xff]  ;;  %v41_v21 = vld [vmem:[%s1165_s4 + $0x10] sm:$0xff]  ;;  %942 = vset.pattern.permute.xlu0 %v976_v42  ;;  %vm512_vm9 = vcmask 64512   ;;  %s759_s25 = sshll.u32 %s1170_s9, 4  ;;  %s760_s25 = int_to_ptr.vmem [resolvable:$true] %s759_s25 }
   0x8   :  { %889 = vmatpush3.bf16.msra.mxu0 %v888_v7  ;;  %v412_v16 = vld [vmem:[%s1169_s8] sm:$0xff]  ;;  %v42_v22 = vld [vmem:[%s1165_s4 + $0x18] sm:$0xff]  ;;  %v44_v25 = vld [vmem:[%s1165_s4 + $0x28] sm:$0xff]  ;;  %s959_s5 = scalar_lea.vmem %s760_s25, 16  ;;  %p964_p1 = scmp.lt.s32.totalorder %s760_s25, %s760_s25 }
   0x9   :  { %902 = vmatprep.subr.bf16.mxu0 %v973_v3  ;;  %v414_v17 = vsel %vm413_vm2, %v412_v16, 0.0  ;;  %v39_v18 = vld [vmem:[%s1165_s4] sm:$0xff]  ;;  %v894_v23 = vpack.c.bf16 %v42_v22, %v41_v21  ;;  %v231_v28 = vld [vmem:[%s1168_s7 + $0x8] sm:$0xff]  ;;  %v45_v30 = vld [vmem:[%s1165_s4 + $0x30] sm:$0xff]  ;;  %p960_p0 = scmp.ne.s32.totalorder %s760_s25, %s959_s5  ;;  %p965_p2 = scmp.lt.s32.totalorder %s959_s5, %s959_s5 }
   0xa   :  { %415 = vadd.xlane.f32.xlu0 %v414_v17  ;;  %v891_v20 = vpack.c.bf16 %v40_v19, %v39_v18  ;;  %v43_v24 = vld [vmem:[%s1165_s4 + $0x20] sm:$0xff]  ;;  %v46_v31 = vld [vmem:[%s1165_s4 + $0x38] sm:$0xff]  ;;  %v232_v32 = vld [vmem:[%s1168_s7 + $0x10] sm:$0xff] }
   0xb   :  { %825 = vmatmul.mubr.msk.f32.vlgmr.msra.gmra.mrb[0].mxu0 %vm53_vm1, %v33_v10  ;;  %v230_v26 = vld [vmem:[%s1168_s7] sm:$0xff]  ;;  %v897_v27 = vpack.c.bf16 %v44_v25, %v43_v24  ;;  %v900_v33 = vpack.c.bf16 %v46_v31, %v45_v30  ;;  %v233_v34 = vld [vmem:[%s1168_s7 + $0x18] sm:$0xff]  ;;  %v235_v37 = vld [vmem:[%s1168_s7 + $0x28] sm:$0xff]  ;;  %p966_p3 = por %p965_p2, %p964_p1 }
   0xc   :  { %904 = vmatpush3.bf16.msra.mxu0 %v903_v11  ;;  %854 = vmatprep.mubr.msk.f32.mxu0 %vm974_vm0, %v975_v6  ;;  %v909_v29 = vpack.c.bf16 %v231_v28, %v230_v26  ;;  %v912_v35 = vpack.c.bf16 %v233_v34, %v232_v32  ;;  %v234_v36 = vld [vmem:[%s1168_s7 + $0x20] sm:$0xff]  ;;  %v236_v39 = vld [vmem:[%s1168_s7 + $0x30] sm:$0xff]  ;;  %v237_v40 = vld [vmem:[%s1168_s7 + $0x38] sm:$0xff] }
   0xd   :  { %905 = vmatprep.subr.bf16.mxu0 %v973_v3  ;;  %892 = vmatpush3.bf16.msra.mxu1 %v891_v20  ;;  %v915_v38 = vpack.c.bf16 %v235_v37, %v234_v36  ;;  %v918_v41 = vpack.c.bf16 %v237_v40, %v236_v39  ;;  %v768_v43 = vld [vmem:[%s1164_s3] ss:$0 sm:$0xff]  ;;  %p967_p4 = pnand %p966_p3, %p960_p0 }
   0xe   :  { %893 = vmatprep.subr.bf16.mxu1 %v973_v3  ;;  %v771_v50 = vld [vmem:[%s1167_s6] ss:$0 sm:$0xff]  ;;  %s977_s6 = smov 1.0  }
  0x10   :  { %907 = vmatpush3.bf16.msra.mxu0 %v906_v14 }
  0x11   :  { %908 = vmatprep.subr.bf16.mxu0 %v973_v3  ;;  %895 = vmatpush3.bf16.msra.mxu1 %v894_v23 }
  0x12   :  { %896 = vmatprep.subr.bf16.mxu1 %v973_v3 }
  0x13   :  { %855 = vmatmul.mubr.msk.f32.vlgmr.msra.gmra.mrb[2].mxu0 %vm53_vm1, %v224_v15 }
  0x14   :  { %873 = vmatprep.mubr.msk.f32.mxu0 %vm974_vm0, %v975_v6  ;;  %910 = vmatpush3.bf16.msra.mxu0 %v909_v29 }
  0x15   :  { %898 = vmatpush3.bf16.msra.mxu1 %v897_v27  ;;  %911 = vmatprep.subr.bf16.mxu0 %v973_v3 }
  0x16   :  { %899 = vmatprep.subr.bf16.mxu1 %v973_v3 }
  0x18   :  { %913 = vmatpush3.bf16.msra.mxu0 %v912_v35 }
  0x19   :  { %901 = vmatpush3.bf16.msra.mxu1 %v900_v33  ;;  %914 = vmatprep.subr.bf16.mxu0 %v973_v3 }
  0x1c   :  { %916 = vmatpush3.bf16.msra.mxu0 %v915_v38 }
  0x1d   :  { %917 = vmatprep.subr.bf16.mxu0 %v973_v3 }
  0x20   :  { %919 = vmatpush3.bf16.msra.mxu0 %v918_v41  ;;  %430 = vperm.xlu0 %942, %v412_v16  }
  0x97   :  { %v416_v3 = vpop.xlane.xlu0 %415 }
  0x98   :  { %v417_v4 = vrot.slane %v416_v3, 4 }
  0x9a   :  { %v418_v8 = vadd.f32 %v417_v4, %v416_v3 }
  0x9c   :  { %v419_v11 = vrot.slane %v418_v8, 2 }
  0x9e   :  { %v420_v14 = vadd.f32 %v419_v11, %v418_v8 }
  0x9f   :  { %v431_v42 = vpop.permute.xlu0 %430 }
  0xa0   :  { %v421_v17 = vrot.slane %v420_v14, 1 }
  0xa2   :  { %v422_v21 = vadd.f32 %v421_v17, %v420_v14 }
  0xa4   :  { %920 = vpush %v422_v21 }
  0xd5   :  { %s921_s3 = spop %920 }
  0xd6   :  { %s424_s13 = smax.f32 %s977_s6, %s921_s3 }
  0xd7   :  { %v425_v38 = vstv %s424_s13  ;;  %s778_s14 = sadd.f32 -1.0, %s424_s13 }
  0xd9   :  { %s615_s15 = smax.f32 %s977_s6, %s778_s14 }
  0xda   :  { %v616_v39 = vstv %s615_s15 }
  0xde   :  { %v123_v44 = vpop.f32.mrb[0].mxu0 }
  0xdf   :  { %v124_v45 = vadd.f32 %v768_v43, %v123_v44  ;;  %v826_v46 = vpop.f32.mrb[1].mxu0 }
  0xe1   :  { %v128_v47 = vsel %vm127_vm3, %v124_v45, 0.0 }
  0xe2   :  { %v129_v48 = vrot.slane %v128_v47, 4 }
  0xe4   :  { %v130_v49 = vadd.f32 %v129_v48, %v128_v47 }
  0xe6   :  { %v131_v51 = vrot.slane %v130_v49, 2  ;;  %v313_v52 = vpop.f32.mrb[2].mxu0 }
  0xe7   :  { %v314_v53 = vadd.f32 %v771_v50, %v313_v52  ;;  %v856_v54 = vpop.f32.mrb[3].mxu0 }
  0xe8   :  { %v132_v55 = vadd.f32 %v131_v51, %v130_v49 }
  0xe9   :  { %v317_v56 = vsel %vm127_vm3, %v314_v53, 0.0 }
  0xea   :  { %v133_v57 = vrot.slane %v132_v55, 1  ;;  %v318_v58 = vrot.slane %v317_v56, 4 }
  0xec   :  { %v134_v59 = vadd.f32 %v133_v57, %v132_v55  ;;  %v319_v60 = vadd.f32 %v318_v58, %v317_v56 }
  0xee   :  { %v136_v61 = vmul.f32 0.125, %v134_v59  ;;  %v320_v62 = vrot.slane %v319_v60, 2 }
  0xf0   :  { %v137_v63 = vsub.f32 %v124_v45, %v136_v61  ;;  %v321_v0 = vadd.f32 %v320_v62, %v319_v60 }
  0xf2   :  { %v138_v1 = vmul.f32 %v137_v63, %v137_v63  ;;  %v322_v2 = vrot.slane %v321_v0, 1 }
  0xf4   :  { %v139_v5 = vsel %vm127_vm3, %v138_v1, 0.0  ;;  %v323_v6 = vadd.f32 %v322_v2, %v321_v0 }
  0xf5   :  { %v140_v7 = vrot.slane %v139_v5, 4 }
  0xf6   :  { %v324_v9 = vmul.f32 0.125, %v323_v6 }
  0xf7   :  { %v141_v10 = vadd.f32 %v140_v7, %v139_v5 }
  0xf8   :  { %v325_v12 = vsub.f32 %v314_v53, %v324_v9 }
  0xf9   :  { %v142_v13 = vrot.slane %v141_v10, 2 }
  0xfa   :  { %v326_v15 = vmul.f32 %v325_v12, %v325_v12 }
  0xfb   :  { %v143_v16 = vadd.f32 %v142_v13, %v141_v10 }
  0xfc   :  { %v327_v18 = vsel %vm127_vm3, %v326_v15, 0.0 }
  0xfd   :  { %v144_v19 = vrot.slane %v143_v16, 1  ;;  %v328_v20 = vrot.slane %v327_v18, 4 }
  0xff   :  { %v145_v22 = vadd.f32 %v144_v19, %v143_v16  ;;  %v329_v23 = vadd.f32 %v328_v20, %v327_v18 }
 0x101   :  { %v146_v24 = vmul.f32 0.125, %v145_v22  ;;  %v330_v25 = vrot.slane %v329_v23, 2 }
 0x103   :  { %v147_v26 = vadd.f32 1e-05, %v146_v24  ;;  %v331_v27 = vadd.f32 %v330_v25, %v329_v23 }
 0x105   :  { %943 = vrsqrt.f32 %v147_v26  ;;  %v332_v28 = vrot.slane %v331_v27, 1 }
 0x107   :  { %v333_v29 = vadd.f32 %v332_v28, %v331_v27 }
 0x109   :  { %v334_v30 = vmul.f32 0.125, %v333_v29 }
 0x10b   :  { %v335_v31 = vadd.f32 1e-05, %v334_v30 }
 0x10d   :  { %945 = vrsqrt.f32 %v335_v31 }
 0x10e   :  { %947 = vrcp.f32 %v425_v38 }
 0x10f   :  { %v944_v32 = vpop.eup %943  ;;  %949 = vrcp.f32 %v616_v39 }
 0x110   :  { %v149_v33 = vmul.f32 %v944_v32, %v137_v63 }
 0x112   :  { %v150_v34 = vmax.f32 %v149_v33, 0.0 }
 0x114   :  { %844 = vmatmul.mubr.msk.f32.vlgmr.msra.gmra.mrb[0].mxu1 %vm127_vm3, %v150_v34 }
 0x117   :  { %v946_v35 = vpop.eup %945 }
 0x118   :  { %v337_v36 = vmul.f32 %v946_v35, %v325_v12  ;;  %v948_v40 = vpop.eup %947 }
 0x119   :  { %922 = vpush %v948_v40  ;;  %v950_v41 = vpop.eup %949 }
 0x11a   :  { %v338_v37 = vmax.f32 %v337_v36, 0.0  ;;  %924 = vpush %v950_v41 }
 0x11c   :  { %874 = vmatmul.mubr.msk.f32.vlgmr.msra.gmra.mrb[4].mxu0 %vm127_vm3, %v338_v37 }
 0x14a   :  { %s923_s16 = spop %922 }
 0x14b   :  { %v441_v59 = vstv %s923_s16  ;;  %s925_s17 = spop %924 }
 0x14c   :  { %v619_v24 = vstv %s925_s17 }
 0x1e7   :  { %v220_v43 = vpop.f32.mrb[0].mxu1 }
 0x1e8   :  { %v433_v44 = vmul.f32 %v431_v42, %v220_v43  ;;  %v845_v45 = vpop.f32.mrb[1].mxu1 }
 0x1ea   :  { %v434_v46 = vsel %vm53_vm1, %v433_v44, 0.0 }
 0x1eb   :  { %v435_v47 = vrot.slane %v434_v46, 4 }
 0x1ed   :  { %v436_v48 = vadd.f32 %v435_v47, %v434_v46 }
 0x1ef   :  { %v437_v49 = vrot.slane %v436_v48, 2  ;;  %v408_v50 = vpop.f32.mrb[4].mxu0 }
 0x1f0   :  { %v453_v51 = vmul.f32 %v431_v42, %v408_v50  ;;  %v875_v52 = vpop.f32.mrb[5].mxu0 }
 0x1f1   :  { %v438_v53 = vadd.f32 %v437_v49, %v436_v48 }
 0x1f2   :  { %v454_v54 = vsel %vm53_vm1, %v453_v51, 0.0 }
 0x1f3   :  { %v455_v55 = vrot.slane %v454_v54, 4  ;;  %v439_v56 = vrot.slane %v438_v53, 1 }
 0x1f5   :  { %v456_v57 = vadd.f32 %v455_v55, %v454_v54  ;;  %v440_v58 = vadd.f32 %v439_v56, %v438_v53 }
 0x1f7   :  { %v457_v60 = vrot.slane %v456_v57, 2  ;;  %v442_v61 = vmul.f32 %v441_v59, %v440_v58 }
 0x1f9   :  { %v458_v62 = vadd.f32 %v457_v60, %v456_v57  ;;  %v443_v63 = vsub.f32 %v220_v43, %v442_v61 }
 0x1fb   :  { %v444_v0 = vmul.f32 %v443_v63, %v431_v42  ;;  %v459_v1 = vrot.slane %v458_v62, 1 }
 0x1fd   :  { %v460_v2 = vadd.f32 %v459_v1, %v458_v62  ;;  %v445_v3 = vmul.f32 %v444_v0, %v444_v0 }
 0x1ff   :  { %v461_v4 = vmul.f32 %v460_v2, %v441_v59  ;;  %v446_v5 = vsel %vm53_vm1, %v445_v3, 0.0 }
 0x200   :  { %v447_v6 = vrot.slane %v446_v5, 4 }
 0x201   :  { %v462_v7 = vsub.f32 %v408_v50, %v461_v4 }
 0x202   :  { %v448_v8 = vadd.f32 %v447_v6, %v446_v5  ;;  %v667_v5 = vlaneseq }
 0x203   :  { %v463_v9 = vmul.f32 %v462_v7, %v431_v42 }
 0x204   :  { %v449_v10 = vrot.slane %v448_v8, 2  ;;  %v668_v6 = vshrl.u32 %v667_v5, 7 }
 0x205   :  { %v464_v11 = vmul.f32 %v463_v9, %v463_v9 }
 0x206   :  { %v450_v12 = vadd.f32 %v449_v10, %v448_v8  ;;  %v669_v7 = vadd.s32 8, %v668_v6  ;;  %v673_v8 = vand.u32 127, %v667_v5 }
 0x207   :  { %v465_v13 = vsel %vm53_vm1, %v464_v11, 0.0 }
 0x208   :  { %v451_v14 = vrot.slane %v450_v12, 1  ;;  %v466_v15 = vrot.slane %v465_v13, 4  ;;  %vm675_vm10 = vcmp.eq.s32.totalorder %v669_v7, %v673_v8  ;;  %vm674_vm11 = vcmp.eq.s32.totalorder %v668_v6, %v673_v8 }
 0x20a   :  { %v452_v16 = vadd.f32 %v451_v14, %v450_v12  ;;  %v467_v17 = vadd.f32 %v466_v15, %v465_v13 }
 0x20c   :  { %v468_v18 = vrot.slane %v467_v17, 2  ;;  %v472_v19 = vmul.f32 %v452_v16, %v441_v59  ;;  %v620_v38 = vmul.f32 %v619_v24, %v452_v16 }
 0x20e   :  { %v469_v20 = vadd.f32 %v468_v18, %v467_v17  ;;  %v473_v21 = vadd.f32 1e-05, %v472_v19  ;;  %v621_v41 = vadd.f32 0.0001, %v620_v38 }
 0x210   :  { %v470_v22 = vrot.slane %v469_v20, 1  ;;  %951 = vrsqrt.f32 %v473_v21  ;;  %vm624_vm7 = vcmp.eq.f32.partialorder %v621_v41, inf  ;;  %v627_v46 = vand.u32 2147483648, %v621_v41 }
 0x211   :  { %vm626_vm8 = vcmp.eq.f32.partialorder %v621_v41, 0.0 }
 0x212   :  { %v471_v23 = vadd.f32 %v470_v22, %v469_v20  ;;  %v671_v20 = vadd.s32 24, %v668_v6 }
 0x214   :  { %v476_v25 = vmul.f32 %v471_v23, %v441_v59  ;;  %v629_v26 = vmul.f32 %v619_v24, %v471_v23  ;;  %vm677_vm13 = vcmp.eq.s32.totalorder %v671_v20, %v673_v8 }
 0x216   :  { %v477_v27 = vadd.f32 1e-05, %v476_v25  ;;  %v630_v28 = vadd.f32 0.0001, %v629_v26 }
 0x218   :  { %953 = vrsqrt.f32 %v477_v27  ;;  %vm633_vm4 = vcmp.eq.f32.partialorder %v630_v28, inf  ;;  %v636_v35 = vand.u32 2147483648, %v630_v28  ;;  %vm635_vm5 = vcmp.eq.f32.partialorder %v630_v28, 0.0 }
 0x219   :  { %955 = vrsqrt.f32 %v630_v28  ;;  %v670_v27 = vadd.s32 16, %v668_v6 }
 0x21a   :  { %v952_v29 = vpop.eup %951  ;;  %957 = vrsqrt.f32 %v621_v41 }
 0x21b   :  { %v475_v30 = vmul.f32 %v952_v29, %v444_v0  ;;  %vm676_vm12 = vcmp.eq.s32.totalorder %v670_v27, %v673_v8 }
 0x21d   :  { %480 = vxpose.xlu1.b32.start.end [1/1] (short) (narrow) %v475_v30, 32 }
 0x222   :  { %v954_v31 = vpop.eup %953 }
 0x223   :  { %v956_v32 = vpop.eup %955  ;;  %v479_v33 = vmul.f32 %v954_v31, %v463_v9 }
 0x224   :  { %v632_v34 = vmul.f32 %v956_v32, %v630_v28  ;;  %v958_v43 = vpop.eup %957 }
 0x225   :  { %876 = vmatprep.subr.mxu1 %v479_v33  ;;  %v623_v44 = vmul.f32 %v958_v43, %v621_v41 }
 0x226   :  { %877 = vmatpush3.msra.mxu1 %v479_v33  ;;  %v634_v36 = vsel %vm633_vm4, %v630_v28, %v632_v34 }
 0x227   :  { %v637_v37 = vsel %vm635_vm5, %v636_v35, %v634_v36  ;;  %v625_v45 = vsel %vm624_vm7, %v621_v41, %v623_v44 }
 0x228   :  { %v651_v39 = vsub.f32 1.0, %v637_v37  ;;  %v628_v47 = vsel %vm626_vm8, %v627_v46, %v625_v45 }
 0x229   :  { %v638_v48 = vsub.f32 1.0, %v628_v47 }
 0x22a   :  { %v652_v40 = vmax.f32 %v651_v39, 0.0 }
 0x22b   :  { %v639_v49 = vmax.f32 %v638_v48, 0.0 }
 0x22c   :  { %v653_v42 = vsel %vm640_vm6, %v652_v40, 0.0 }
 0x22d   :  { %654 = vadd.xlane.f32.xlu0 %v653_v42  ;;  %v641_v50 = vsel %vm640_vm6, %v639_v49, 0.0 }
 0x250   :  { %642 = vadd.xlane.f32.xlu1 %v641_v50 }
 0x29d   :  { %v496_v51 = vpop.trf.xlu1 }
 0x29e   :  { %878 = vmatprep.mubr.msk.f32.mxu1 %vm512_vm9, %v496_v51 }
 0x2a1   :  { %v497_v52 = vpop.trf.xlu1 }
 0x2a2   :  { %879 = vmatmul.mubr.msk.f32.vlgmr.msra.gmra.mrb[2].mxu1 %vm512_vm9, %v497_v52 }
 0x2a5   :  { %v498_v53 = vpop.trf.xlu1 }
 0x2a6   :  { %881 = vmatprep.mubr.msk.f32.mxu1 %vm512_vm9, %v498_v53 }
 0x2a9   :  { %v499_v54 = vpop.trf.xlu1 }
 0x2aa   :  { %882 = vmatmul.mubr.msk.f32.gmra.mrb[4].mxu1 %vm512_vm9, %v499_v54 }
 0x2ba   :  { %v655_v55 = vpop.xlane.xlu0 %654 }
 0x2bb   :  { %v656_v56 = vrot.slane %v655_v55, 4 }
 0x2bd   :  { %v657_v57 = vadd.f32 %v656_v56, %v655_v55 }
 0x2bf   :  { %v658_v58 = vrot.slane %v657_v57, 2 }
 0x2c1   :  { %v659_v62 = vadd.f32 %v658_v58, %v657_v57 }
 0x2c3   :  { %v660_v1 = vrot.slane %v659_v62, 1 }
 0x2c5   :  { %v661_v4 = vadd.f32 %v660_v1, %v659_v62 }
 0x2dd   :  { %v643_v59 = vpop.xlane.xlu1 %642 }
 0x2de   :  { %v644_v60 = vrot.slane %v643_v59, 4 }
 0x2e0   :  { %v645_v61 = vadd.f32 %v644_v60, %v643_v59 }
 0x2e2   :  { %v646_v63 = vrot.slane %v645_v61, 2 }
 0x2e4   :  { %v647_v0 = vadd.f32 %v646_v63, %v645_v61 }
 0x2e6   :  { %v648_v2 = vrot.slane %v647_v0, 1 }
 0x2e8   :  { %v649_v3 = vadd.f32 %v648_v2, %v647_v0 }
 0x2ea   :  { %926 = vpush %v649_v3 }
 0x2eb   :  { %928 = vpush %v661_v4 }
 0x31b   :  { %s927_s18 = spop %926 }
 0x31c   :  { %s929_s19 = spop %928 }
 0x31d   :  { %s663_s20 = sadd.f32 %s929_s19, %s927_s18 }
 0x31f   :  { %s666_s2 = smul.f32 0.015625, %s663_s20 }
 0x321   :  { %752 = sst [smem:[#allocation2 + $0x2]] %s666_s2 }
 0x375   :  { %v880_v9 = vpop.f32.mrb[2].mxu1 }
 0x376   :  { %v611_v10 = vmul.f32 0.125, %v880_v9  ;;  %v591_v11 = vpop.f32.mrb[3].mxu1 }
 0x377   :  { %v610_v12 = vmul.f32 0.125, %v591_v11 }
 0x378   :  { %v679_v13 = vmul.f32 %v611_v10, %v611_v10  ;;  %v780_v14 = vadd.f32 -1.0, %v611_v10 }
 0x379   :  { %v678_v15 = vmul.f32 %v610_v12, %v610_v12  ;;  %v779_v16 = vadd.f32 -1.0, %v610_v12 }
 0x37a   :  { %v683_v17 = vsel %vm675_vm10, %v679_v13, 0.0  ;;  %v707_v18 = vmul.f32 %v780_v14, %v780_v14  ;;  %v731_v19 = vsel %vm53_vm1, %v679_v13, 0.0 }
 0x37b   :  { %v687_v21 = vsel %vm53_vm1, %v683_v17, 0.0  ;;  %v682_v22 = vsel %vm674_vm11, %v678_v15, 0.0  ;;  %v706_v23 = vmul.f32 %v779_v16, %v779_v16  ;;  %v730_v24 = vsel %vm53_vm1, %v678_v15, 0.0 }
 0x37c   :  { %v711_v25 = vsel %vm675_vm10, %v707_v18, 0.0  ;;  %v686_v26 = vsel %vm53_vm1, %v682_v22, 0.0  ;;  %v732_v28 = vadd.f32 %v731_v19, %v730_v24 }
 0x37d   :  { %v715_v29 = vsel %vm53_vm1, %v711_v25, 0.0  ;;  %v710_v30 = vsel %vm674_vm11, %v706_v23, 0.0  ;;  %v883_v31 = vpop.f32.mrb[4].mxu1  ;;  %v688_v32 = vadd.f32 %v687_v21, %v686_v26 }
 0x37e   :  { %v714_v33 = vsel %vm53_vm1, %v710_v30, 0.0  ;;  %v613_v34 = vmul.f32 0.125, %v883_v31  ;;  %v601_v35 = vpop.f32.mrb[5].mxu1 }
 0x37f   :  { %v612_v36 = vmul.f32 0.125, %v601_v35  ;;  %v716_v37 = vadd.f32 %v715_v29, %v714_v33 }
 0x380   :  { %v681_v38 = vmul.f32 %v613_v34, %v613_v34  ;;  %v782_v39 = vadd.f32 -1.0, %v613_v34 }
 0x381   :  { %v680_v40 = vmul.f32 %v612_v36, %v612_v36  ;;  %v781_v41 = vadd.f32 -1.0, %v612_v36 }
 0x382   :  { %v709_v42 = vmul.f32 %v782_v39, %v782_v39  ;;  %v685_v46 = vsel %vm677_vm13, %v681_v38, 0.0  ;;  %v735_v52 = vsel %vm53_vm1, %v681_v38, 0.0 }
 0x383   :  { %v684_v43 = vsel %vm676_vm12, %v680_v40, 0.0  ;;  %v708_v44 = vmul.f32 %v781_v41, %v781_v41  ;;  %v733_v45 = vsel %vm53_vm1, %v680_v40, 0.0  ;;  %v691_v53 = vsel %vm53_vm1, %v685_v46, 0.0 }
 0x384   :  { %v689_v47 = vsel %vm53_vm1, %v684_v43, 0.0  ;;  %v734_v48 = vadd.f32 %v733_v45, %v732_v28  ;;  %v713_v51 = vsel %vm677_vm13, %v709_v42, 0.0 }
 0x385   :  { %v712_v49 = vsel %vm676_vm12, %v708_v44, 0.0  ;;  %v690_v50 = vadd.f32 %v689_v47, %v688_v32  ;;  %v719_v58 = vsel %vm53_vm1, %v713_v51, 0.0 }
 0x386   :  { %v717_v54 = vsel %vm53_vm1, %v712_v49, 0.0  ;;  %v736_v55 = vadd.f32 %v735_v52, %v734_v48 }
 0x387   :  { %v692_v56 = vadd.f32 %v691_v53, %v690_v50  ;;  %v718_v57 = vadd.f32 %v717_v54, %v716_v37 }
 0x389   :  { %693 = vadd.xlane.f32.xlu1 %v692_v56  ;;  %v720_v59 = vadd.f32 %v719_v58, %v718_v57 }
 0x38d   :  { %721 = vadd.xlane.f32.xlu1 %v720_v59 }
 0x391   :  { %737 = vadd.xlane.f32.xlu1 %v736_v55 }
 0x416   :  { %v694_v60 = vpop.xlane.xlu1 %693 }
 0x417   :  { %v695_v61 = vrot.slane %v694_v60, 4 }
 0x419   :  { %v696_v62 = vadd.f32 %v695_v61, %v694_v60 }
 0x41a   :  { %v722_v63 = vpop.xlane.xlu1 %721 }
 0x41b   :  { %v697_v0 = vrot.slane %v696_v62, 2  ;;  %v723_v1 = vrot.slane %v722_v63, 4 }
 0x41d   :  { %v724_v2 = vadd.f32 %v723_v1, %v722_v63  ;;  %v698_v3 = vadd.f32 %v697_v0, %v696_v62 }
 0x41e   :  { %v738_v4 = vpop.xlane.xlu1 %737 }
 0x41f   :  { %v725_v5 = vrot.slane %v724_v2, 2  ;;  %v739_v6 = vrot.slane %v738_v4, 4  ;;  %v699_v7 = vrot.slane %v698_v3, 1 }
 0x421   :  { %v740_v8 = vadd.f32 %v739_v6, %v738_v4  ;;  %v700_v9 = vadd.f32 %v699_v7, %v698_v3  ;;  %v726_v10 = vadd.f32 %v725_v5, %v724_v2 }
 0x423   :  { %v741_v11 = vrot.slane %v740_v8, 2  ;;  %930 = vpush %v700_v9  ;;  %v727_v12 = vrot.slane %v726_v10, 1 }
 0x425   :  { %v742_v13 = vadd.f32 %v741_v11, %v740_v8  ;;  %v728_v14 = vadd.f32 %v727_v12, %v726_v10 }
 0x427   :  { %932 = vpush %v728_v14  ;;  %v743_v15 = vrot.slane %v742_v13, 1 }
 0x429   :  { %v744_v16 = vadd.f32 %v743_v15, %v742_v13 }
 0x42b   :  { %934 = vpush %v744_v16 }
 0x454   :  { %s931_s21 = spop %930 }
 0x458   :  { %s933_s22 = spop %932 }
 0x459   :  { %748 = sst [smem:[#allocation2]] %s933_s22 }
 0x45c   :  { %s935_s0 = spop %934 }
 0x45d   :  { %s746_s26 = ssub.f32 %s935_s0, %s931_s21 }
 0x45f   :  { %750 = sst [smem:[#allocation2 + $0x1]] %s746_s26 }
 0x460   :  { %970 = shalt.err (!%p967_p4)
}
 0x461   :  { %s978_s27 = smov [#allocation2]  }
 0x462   :  { %762 = dma.smem_to_vmem %s978_s27, 16, %s760_s25, [#allocation3]  }
 0x463   :  { %971 = dma.done.wait [#allocation3], 16  }
 0x464   :  { %972 = vsyncadd [#allocation3], 4294967280 }
 0x465   :  { %766 = sfence }
 0x466   :  { %767 = vsyncpa [#allocation3], 1 }

</bundles_post_ra>
